<compile_context>
chip_gen: v6e
topology: v6e:2x2x1
jax: 0.10.0
libtpu: 0.0.40
codegen_flags: <defaults>
</compile_context>

<pallas_src>
import jax
import jax.numpy as jnp
from jax.experimental import pallas as pl
from jax.experimental.pallas import tpu as pltpu


def _round_up(n, m):
    return ((n + m - 1) // m) * m


LEAD = 8     # sublane-aligned lead rows (>= PAD) in each staging buffer
PAD = 2      # Conv1d padding of every layer in this module


# ------------------------------ fused kernel --------------------------------

def _make_fused_kernel(NB, P1, P2, HP2, K2, K3, compute_dtype):
    """Fused conv1->pool->conv2->pool->conv3->pool over NB samples per step."""
    M1 = NB * P1          # flattened rows of pooled-1 (pitch P1 per sample)
    M2 = NB * P2          # flattened rows of pooled-2 (pitch P2 = P1 // 2)
    M3 = NB * HP2         # flattened rows of pooled-3 (pitch HP2 = P2 // 2)

    def conv_relu_pool(src_ref, w_ref, b_ref, mask, M, K):
        """Conv1d(stride=1) + ReLU + MaxPool1d(2) over the flat pitched buffer.

        Even/odd conv output positions are read with stride-2 sublane slices
        and max-reduced; relu(max(even,odd) + b) == maxpool(relu(conv + b)).
        `mask` zeroes per-sample garbage rows so they serve as the next conv's
        zero padding (None for the last layer; its garbage rows are sliced off
        in the wrapper).
        """
        Cout = w_ref.shape[2]
        acc_e = jnp.zeros((M, Cout), jnp.float32)
        acc_o = jnp.zeros((M, Cout), jnp.float32)
        for k in range(K):                                    # static unroll
            w_k = w_ref[k]                                    # (Cin, Cout)
            acc_e += jnp.dot(
                src_ref[pl.ds(LEAD - PAD + k, M, stride=2), :].astype(compute_dtype),
                w_k, preferred_element_type=jnp.float32)
            acc_o += jnp.dot(
                src_ref[pl.ds(LEAD - PAD + 1 + k, M, stride=2), :].astype(compute_dtype),
                w_k, preferred_element_type=jnp.float32)
        h = jnp.maximum(jnp.maximum(acc_e, acc_o) + b_ref[...], 0.0)
        return h if mask is None else h * mask

    def kernel(x_ref, w1_ref, b1_ref, w2_ref, b2_ref, w3_ref, b3_ref,
               m1_ref, m2_ref, o_ref, p1_ref, p2_ref):
        # ---- layer 1: Conv1d(9->64, K=6, pad=2) + ReLU + MaxPool(2) --------
        # x_ref is the wrapper-side im2col: (2 parities, NB*P1, 54->64 feats).
        w1 = w1_ref[...]
        acc_e = jnp.dot(x_ref[0], w1, preferred_element_type=jnp.float32)
        acc_o = jnp.dot(x_ref[1], w1, preferred_element_type=jnp.float32)
        h1 = jnp.maximum(jnp.maximum(acc_e, acc_o) + b1_ref[...], 0.0) * m1_ref[...]
        # Zero only the LEAD rows each step (one aligned (8,128) store); every
        # other row is fully overwritten below.  Kept per-step so it remains
        # correct when the parallel grid axis is sharded across TensorCores.
        p1_ref[pl.ds(0, LEAD), :] = jnp.zeros((LEAD, p1_ref.shape[1]), p1_ref.dtype)
        p1_ref[pl.ds(LEAD, M1), :] = h1                       # aligned store

        # ---- layer 2: Conv1d(64->128, K=3, pad=2) + ReLU + MaxPool(2) ------
        h2 = conv_relu_pool(p1_ref, w2_ref, b2_ref, m2_ref[...], M2, K2)
        p2_ref[pl.ds(0, LEAD), :] = jnp.zeros((LEAD, p2_ref.shape[1]), p2_ref.dtype)
        p2_ref[pl.ds(LEAD, M2), :] = h2

        # ---- layer 3: Conv1d(128->256, K=3, pad=2) + ReLU + MaxPool(2) -----
        h3 = conv_relu_pool(p2_ref, w3_ref, b3_ref, None, M3, K3)
        o_ref[...] = h3.astype(o_ref.dtype)

    return kernel


# ------------------------------ forward wrapper ------------------------------

def cnn_network_uci_forward(x_ncl, params, compute_dtype=jnp.bfloat16,
                            block_samples=64):
    """Matches cnnNetwork_UCI.forward (eval mode).

    x_ncl: (N, 9, L) PyTorch NCL layout; returns (N, 256, L_final) NCL float32.
    compute_dtype: MXU feed dtype (bf16 default); accumulation is always f32.
    block_samples: samples processed per grid step.
    """
    w1, b1 = params["w1"], params["b1"]
    w2, b2 = params["w2"], params["b2"]
    w3, b3 = params["w3"], params["b3"]

    N, Cin, L = x_ncl.shape
    C1, _, K1 = w1.shape            # (64, 9, 6)
    C2, _, K2 = w2.shape            # (128, 64, 3)
    C3, _, K3 = w3.shape            # (256, 128, 3)
    LANE = 128
    C1_P = _round_up(C1, LANE)      # 64 -> 128 (lane-dense conv1 output/staging)
    F1 = _round_up(K1 * Cin, 64)    # conv1 im2col features: 54 -> 64

    # Static per-layer lengths (PyTorch floor semantics for MaxPool1d).
    L1 = L + 2 * PAD - K1 + 1
    L1P = L1 // 2
    L2 = L1P + 2 * PAD - K2 + 1
    L2P = L2 // 2
    L3 = L2P + 2 * PAD - K3 + 1
    L3P = L3 // 2

    # Per-sample row pitches of the flat staging layout.  P1 must be even,
    # >= L1P + PAD, and P1//2 (conv3's input pitch) must be even and
    # >= L2P + PAD so each sample's zeroed garbage rows cover the next conv's
    # window overhang; rounding to 8 keeps every store sublane aligned.
    P1 = _round_up(max(L1P + PAD, 2 * (L2P + PAD)), 8)
    P2 = P1 // 2
    HP2 = P2 // 2                   # row pitch of the final pooled-3 output

    # Samples per grid step (multiple of 8 when the grid has >1 step so block
    # row counts stay sublane aligned).
    if N <= block_samples:
        NB = N
    else:
        NB = max(8, (block_samples // 8) * 8)
    G = -(-N // NB)
    N_pad = G * NB

    # --------------------- one-time layout prep (plain JAX) -----------------
    # NCL -> NLC, zero-pad length by conv1's padding and batch up to N_pad.
    x_nlc = jnp.transpose(x_ncl, (0, 2, 1)).astype(jnp.float32)
    x_pad = jnp.pad(x_nlc, ((0, N_pad - N), (PAD, PAD), (0, 0)))

    # conv1 im2col, parity split (even/odd conv positions = maxpool pairs),
    # each parity laid out with per-sample pitch P1 and F1 features.
    win = jnp.stack([x_pad[:, k:k + 2 * L1P, :] for k in range(K1)], axis=2)
    cols = win.reshape(N_pad, 2 * L1P, K1 * Cin)        # (n, p, k*Cin + c)

    def _stage(c):
        c = jnp.pad(c, ((0, 0), (0, P1 - L1P), (0, F1 - K1 * Cin)))
        return c.reshape(N_pad * P1, F1)

    x_cols = jnp.stack([_stage(cols[:, 0::2, :]), _stage(cols[:, 1::2, :])],
                       axis=0).astype(compute_dtype)     # (2, N_pad*P1, F1)

    # Weights: conv1 as an im2col matrix (K1*Cin, C1) padded to (F1, C1_P);
    # conv2/conv3 as (K, Cin, Cout) with conv2's Cin padded to C1_P (padded
    # rows are zero so semantics are exactly preserved).
    w1m = jnp.transpose(w1, (2, 1, 0)).reshape(K1 * Cin, C1)
    w1p = jnp.pad(w1m, ((0, F1 - K1 * Cin), (0, C1_P - C1))).astype(compute_dtype)
    w2p = jnp.pad(jnp.transpose(w2, (2, 1, 0)),
                  ((0, 0), (0, C1_P - C1), (0, 0))).astype(compute_dtype)
    w3p = jnp.transpose(w3, (2, 1, 0)).astype(compute_dtype)
    b1p = jnp.pad(b1, (0, C1_P - C1)).reshape(1, C1_P).astype(jnp.float32)
    b2p = b2.reshape(1, C2).astype(jnp.float32)
    b3p = b3.reshape(1, C3).astype(jnp.float32)

    # Row-validity masks (1.0 for real rows, 0.0 for per-sample garbage rows);
    # the zeroed garbage rows double as the next conv's zero padding.
    m1 = ((jnp.arange(NB * P1) % P1) < L1P).astype(jnp.float32).reshape(NB * P1, 1)
    m2 = ((jnp.arange(NB * P2) % P2) < L2P).astype(jnp.float32).reshape(NB * P2, 1)

    kernel = _make_fused_kernel(NB, P1, P2, HP2, K2, K3, compute_dtype)

    itemsize = jnp.dtype(compute_dtype).itemsize
    flops = 2 * N_pad * (2 * P1 * F1 * C1_P
                         + K2 * 2 * P2 * C1_P * C2
                         + K3 * 2 * HP2 * C2 * C3)
    bytes_accessed = (itemsize * (x_cols.size + w1p.size + w2p.size + w3p.size)
                      + 4 * (b1p.size + b2p.size + b3p.size + m1.size + m2.size
                             + N_pad * HP2 * C3))

    out_flat = pl.pallas_call(
        kernel,
        out_shape=jax.ShapeDtypeStruct((N_pad * HP2, C3), jnp.float32),
        grid=(G,),                                   # NB samples per grid step
        in_specs=[
            pl.BlockSpec((2, NB * P1, F1), lambda n: (0, n, 0)),     # im2col x
            pl.BlockSpec((F1, C1_P), lambda n: (0, 0)),              # w1 (resident)
            pl.BlockSpec((1, C1_P), lambda n: (0, 0)),               # b1
            pl.BlockSpec((K2, C1_P, C2), lambda n: (0, 0, 0)),       # w2
            pl.BlockSpec((1, C2), lambda n: (0, 0)),                 # b2
            pl.BlockSpec((K3, C2, C3), lambda n: (0, 0, 0)),         # w3
            pl.BlockSpec((1, C3), lambda n: (0, 0)),                 # b3
            pl.BlockSpec((NB * P1, 1), lambda n: (0, 0)),            # row mask 1
            pl.BlockSpec((NB * P2, 1), lambda n: (0, 0)),            # row mask 2
        ],
        out_specs=pl.BlockSpec((NB * HP2, C3), lambda n: (n, 0)),
        scratch_shapes=[
            pltpu.VMEM((LEAD + NB * P1, C1_P), jnp.float32),   # staged pooled-1
            pltpu.VMEM((LEAD + NB * P2, C2), jnp.float32),     # staged pooled-2
        ],
        compiler_params=pltpu.CompilerParams(
            dimension_semantics=("parallel",)),
        cost_estimate=pl.CostEstimate(
            flops=flops, transcendentals=0, bytes_accessed=bytes_accessed),
    )(x_cols, w1p, b1p, w2p, b2p, w3p, b3p, m1, m2)

    # Drop per-sample pitch padding + batch padding; back to PyTorch NCL.
    out = out_flat.reshape(N_pad, HP2, C3)[:N, :L3P, :]
    # TODO(synk): nn.Dropout(0.1) is identity in eval mode; training-mode random
    # masking/scaling is intentionally not implemented here.
    return jnp.transpose(out, (0, 2, 1))


# ------------------------------ params & reference ---------------------------

def init_params(key):
    """Deterministic synthetic parameters matching cnnNetwork_UCI's conv shapes."""
    ks = jax.random.split(key, 6)

    def conv_init(kw, kb, cout, cin, ksz):
        fan_in = cin * ksz
        bound = 1.0 / jnp.sqrt(fan_in)
        w = jax.random.uniform(kw, (cout, cin, ksz), jnp.float32, -bound, bound)
        b = jax.random.uniform(kb, (cout,), jnp.float32, -bound, bound)
        return w, b

    w1, b1 = conv_init(ks[0], ks[1], 64, 9, 6)
    w2, b2 = conv_init(ks[2], ks[3], 128, 64, 3)
    w3, b3 = conv_init(ks[4], ks[5], 256, 128, 3)
    return dict(w1=w1, b1=b1, w2=w2, b2=b2, w3=w3, b3=b3)


def _conv1d_ref(x_ncl, w, b, padding):
    out = jax.lax.conv_general_dilated(
        x_ncl, w, window_strides=(1,), padding=[(padding, padding)],
        dimension_numbers=("NCH", "OIH", "NCH"))
    return out + b[None, :, None]


def _maxpool1d_ref(x_ncl):
    n, c, l = x_ncl.shape
    lp = l // 2
    return x_ncl[:, :, :2 * lp].reshape(n, c, lp, 2).max(axis=-1)


def cnn_network_uci_ref(x_ncl, params):
    h = _maxpool1d_ref(jnp.maximum(_conv1d_ref(x_ncl, params["w1"], params["b1"], 2), 0.0))
    h = _maxpool1d_ref(jnp.maximum(_conv1d_ref(h, params["w2"], params["b2"], 2), 0.0))
    h = _maxpool1d_ref(jnp.maximum(_conv1d_ref(h, params["w3"], params["b3"], 2), 0.0))
    return h


# ---------------------------------- main -------------------------------------

if __name__ == "__main__":
    key = jax.random.PRNGKey(0)
    k_x, k_p = jax.random.split(key)

    N, Cin, L = 2, 9, 32   # small UCI-HAR-style input (module expects 9 channels)
    x = jax.random.normal(k_x, (N, Cin, L), dtype=jnp.float32)
    params = init_params(k_p)

    fwd = jax.jit(cnn_network_uci_forward)
    out = jax.block_until_ready(fwd(x, params))

    # shape: L=32 -> conv1:31 -> pool:15 -> conv2:17 -> pool:8 -> conv3:10 -> pool:5
    assert out.shape == (N, 256, 5), out.shape
    assert out.dtype == jnp.float32

    # correctness vs pure-JAX f32 reference (tolerance covers bf16 MXU feeds)
    ref = jax.block_until_ready(cnn_network_uci_ref(x, params))
    assert jnp.allclose(out, ref, atol=3e-2, rtol=3e-2), \
        float(jnp.max(jnp.abs(out - ref)))

    print("KERNEL_OK")
</pallas_src>

<mosaic_0001>
module attributes {stable_mosaic.version = 11 : i64} {
  func.func @kernel(%arg0: i32, %arg1: memref<2x48x64xbf16, #tpu.memory_space<vmem>>, %arg2: memref<64x128xbf16, #tpu.memory_space<vmem>>, %arg3: memref<1x128xf32, #tpu.memory_space<vmem>>, %arg4: memref<3x128x128xbf16, #tpu.memory_space<vmem>>, %arg5: memref<1x128xf32, #tpu.memory_space<vmem>>, %arg6: memref<3x128x256xbf16, #tpu.memory_space<vmem>>, %arg7: memref<1x256xf32, #tpu.memory_space<vmem>>, %arg8: memref<48x1xf32, #tpu.memory_space<vmem>>, %arg9: memref<24x1xf32, #tpu.memory_space<vmem>>, %arg10: memref<12x256xf32, #tpu.memory_space<vmem>>, %arg11: memref<56x128xf32, #tpu.memory_space<vmem>>, %arg12: memref<32x128xf32, #tpu.memory_space<vmem>>) attributes {dimension_semantics = [#tpu.dimension_semantics<parallel>], iteration_bounds = array<i64: 1>, scalar_prefetch = 0 : i64, scratch_operands = 2 : i64, tpu.core_type = #tpu.core_type<tc>, window_params = [{transform_indices = @transform_0, window_bounds = array<i64: 2, 48, 64>}, {pipeline_mode = #tpu.pipeline_mode<synchronous>, transform_indices = @transform_1, window_bounds = array<i64: 64, 128>}, {pipeline_mode = #tpu.pipeline_mode<synchronous>, transform_indices = @transform_2, window_bounds = array<i64: 1, 128>}, {pipeline_mode = #tpu.pipeline_mode<synchronous>, transform_indices = @transform_3, window_bounds = array<i64: 3, 128, 128>}, {pipeline_mode = #tpu.pipeline_mode<synchronous>, transform_indices = @transform_4, window_bounds = array<i64: 1, 128>}, {pipeline_mode = #tpu.pipeline_mode<synchronous>, transform_indices = @transform_5, window_bounds = array<i64: 3, 128, 256>}, {pipeline_mode = #tpu.pipeline_mode<synchronous>, transform_indices = @transform_6, window_bounds = array<i64: 1, 256>}, {pipeline_mode = #tpu.pipeline_mode<synchronous>, transform_indices = @transform_7, window_bounds = array<i64: 48, 1>}, {pipeline_mode = #tpu.pipeline_mode<synchronous>, transform_indices = @transform_8, window_bounds = array<i64: 24, 1>}, {transform_indices = @transform_9, window_bounds = array<i64: 12, 256>}]} {
    %c0 = arith.constant 0 : index
    %c0_0 = arith.constant 0 : index
    %0 = vector.load %arg2[%c0, %c0_0] : memref<64x128xbf16, #tpu.memory_space<vmem>>, vector<64x128xbf16>
    %c0_1 = arith.constant 0 : index
    %c0_2 = arith.constant 0 : index
    %c0_3 = arith.constant 0 : index
    %1 = vector.load %arg1[%c0_1, %c0_2, %c0_3] : memref<2x48x64xbf16, #tpu.memory_space<vmem>>, vector<1x48x64xbf16>
    %2 = vector.shape_cast %1 : vector<1x48x64xbf16> to vector<48x64xbf16>
    %cst = arith.constant dense<0.000000e+00> : vector<48x128xf32>
    %3 = tpu.matmul %2, %0, %cst {dimension_numbers = #tpu.dot_dimension_numbers<[1], [0], [0], [1], [0, 0, 1, 1], [], []>} : vector<48x64xbf16>, vector<64x128xbf16>, vector<48x128xf32> -> vector<48x128xf32>
    %c1 = arith.constant 1 : index
    %c0_4 = arith.constant 0 : index
    %c0_5 = arith.constant 0 : index
    %4 = vector.load %arg1[%c1, %c0_4, %c0_5] : memref<2x48x64xbf16, #tpu.memory_space<vmem>>, vector<1x48x64xbf16>
    %5 = vector.shape_cast %4 : vector<1x48x64xbf16> to vector<48x64xbf16>
    %cst_6 = arith.constant dense<0.000000e+00> : vector<48x128xf32>
    %6 = tpu.matmul %5, %0, %cst_6 {dimension_numbers = #tpu.dot_dimension_numbers<[1], [0], [0], [1], [0, 0, 1, 1], [], []>} : vector<48x64xbf16>, vector<64x128xbf16>, vector<48x128xf32> -> vector<48x128xf32>
    %7 = arith.maximumf %3, %6 : vector<48x128xf32>
    %c0_7 = arith.constant 0 : index
    %c0_8 = arith.constant 0 : index
    %8 = vector.load %arg3[%c0_7, %c0_8] : memref<1x128xf32, #tpu.memory_space<vmem>>, vector<1x128xf32>
    %9 = vector.broadcast %8 : vector<1x128xf32> to vector<48x128xf32>
    %10 = arith.addf %7, %9 : vector<48x128xf32>
    %cst_9 = arith.constant 0.000000e+00 : f32
    %11 = vector.broadcast %cst_9 : f32 to vector<48x128xf32>
    %12 = arith.maximumf %10, %11 : vector<48x128xf32>
    %c0_10 = arith.constant 0 : index
    %c0_11 = arith.constant 0 : index
    %13 = vector.load %arg8[%c0_10, %c0_11] : memref<48x1xf32, #tpu.memory_space<vmem>>, vector<48x1xf32>
    %14 = vector.broadcast %13 : vector<48x1xf32> to vector<48x128xf32>
    %15 = arith.mulf %12, %14 : vector<48x128xf32>
    %cst_12 = arith.constant 0.000000e+00 : f32
    %16 = vector.broadcast %cst_12 : f32 to vector<8x128xf32>
    %c0_13 = arith.constant 0 : index
    %c0_14 = arith.constant 0 : index
    %17 = vector.load %arg11[%c0_13, %c0_14] : memref<56x128xf32, #tpu.memory_space<vmem>>, vector<8x128xf32>
    tpu.vector_store %arg11[%c0_13, %c0_14], %16 {strides = array<i32>} : memref<56x128xf32, #tpu.memory_space<vmem>>, vector<8x128xf32>,
    %c8 = arith.constant 8 : index
    %c0_15 = arith.constant 0 : index
    %18 = vector.load %arg11[%c8, %c0_15] : memref<56x128xf32, #tpu.memory_space<vmem>>, vector<48x128xf32>
    tpu.vector_store %arg11[%c8, %c0_15], %15 {strides = array<i32>} : memref<56x128xf32, #tpu.memory_space<vmem>>, vector<48x128xf32>,
    %c0_16 = arith.constant 0 : index
    %c0_17 = arith.constant 0 : index
    %19 = vector.load %arg9[%c0_16, %c0_17] : memref<24x1xf32, #tpu.memory_space<vmem>>, vector<24x1xf32>
    %cst_18 = arith.constant 0.000000e+00 : f32
    %20 = vector.broadcast %cst_18 : f32 to vector<24x128xf32>
    %cst_19 = arith.constant 0.000000e+00 : f32
    %21 = vector.broadcast %cst_19 : f32 to vector<24x128xf32>
    %c0_20 = arith.constant 0 : index
    %c0_21 = arith.constant 0 : index
    %c0_22 = arith.constant 0 : index
    %22 = vector.load %arg4[%c0_20, %c0_21, %c0_22] : memref<3x128x128xbf16, #tpu.memory_space<vmem>>, vector<1x128x128xbf16>
    %23 = vector.shape_cast %22 : vector<1x128x128xbf16> to vector<128x128xbf16>
    %c6 = arith.constant 6 : index
    %c0_23 = arith.constant 0 : index
    %24 = tpu.strided_load %arg11[%c6, %c0_23] {strides = array<i32: 2, 1>} : memref<56x128xf32, #tpu.memory_space<vmem>>, vector<24x128xf32>
    %25 = arith.truncf %24 : vector<24x128xf32> to vector<24x128xbf16>
    %cst_24 = arith.constant dense<0.000000e+00> : vector<24x128xf32>
    %26 = tpu.matmul %25, %23, %cst_24 {dimension_numbers = #tpu.dot_dimension_numbers<[1], [0], [0], [1], [0, 0, 1, 1], [], []>} : vector<24x128xbf16>, vector<128x128xbf16>, vector<24x128xf32> -> vector<24x128xf32>
    %27 = arith.addf %20, %26 : vector<24x128xf32>
    %c7 = arith.constant 7 : index
    %c0_25 = arith.constant 0 : index
    %28 = tpu.strided_load %arg11[%c7, %c0_25] {strides = array<i32: 2, 1>} : memref<56x128xf32, #tpu.memory_space<vmem>>, vector<24x128xf32>
    %29 = arith.truncf %28 : vector<24x128xf32> to vector<24x128xbf16>
    %cst_26 = arith.constant dense<0.000000e+00> : vector<24x128xf32>
    %30 = tpu.matmul %29, %23, %cst_26 {dimension_numbers = #tpu.dot_dimension_numbers<[1], [0], [0], [1], [0, 0, 1, 1], [], []>} : vector<24x128xbf16>, vector<128x128xbf16>, vector<24x128xf32> -> vector<24x128xf32>
    %31 = arith.addf %21, %30 : vector<24x128xf32>
    %c1_27 = arith.constant 1 : index
    %c0_28 = arith.constant 0 : index
    %c0_29 = arith.constant 0 : index
    %32 = vector.load %arg4[%c1_27, %c0_28, %c0_29] : memref<3x128x128xbf16, #tpu.memory_space<vmem>>, vector<1x128x128xbf16>
    %33 = vector.shape_cast %32 : vector<1x128x128xbf16> to vector<128x128xbf16>
    %c7_30 = arith.constant 7 : index
    %c0_31 = arith.constant 0 : index
    %34 = tpu.strided_load %arg11[%c7_30, %c0_31] {strides = array<i32: 2, 1>} : memref<56x128xf32, #tpu.memory_space<vmem>>, vector<24x128xf32>
    %35 = arith.truncf %34 : vector<24x128xf32> to vector<24x128xbf16>
    %cst_32 = arith.constant dense<0.000000e+00> : vector<24x128xf32>
    %36 = tpu.matmul %35, %33, %cst_32 {dimension_numbers = #tpu.dot_dimension_numbers<[1], [0], [0], [1], [0, 0, 1, 1], [], []>} : vector<24x128xbf16>, vector<128x128xbf16>, vector<24x128xf32> -> vector<24x128xf32>
    %37 = arith.addf %27, %36 : vector<24x128xf32>
    %c8_33 = arith.constant 8 : index
    %c0_34 = arith.constant 0 : index
    %38 = tpu.strided_load %arg11[%c8_33, %c0_34] {strides = array<i32: 2, 1>} : memref<56x128xf32, #tpu.memory_space<vmem>>, vector<24x128xf32>
    %39 = arith.truncf %38 : vector<24x128xf32> to vector<24x128xbf16>
    %cst_35 = arith.constant dense<0.000000e+00> : vector<24x128xf32>
    %40 = tpu.matmul %39, %33, %cst_35 {dimension_numbers = #tpu.dot_dimension_numbers<[1], [0], [0], [1], [0, 0, 1, 1], [], []>} : vector<24x128xbf16>, vector<128x128xbf16>, vector<24x128xf32> -> vector<24x128xf32>
    %41 = arith.addf %31, %40 : vector<24x128xf32>
    %c2 = arith.constant 2 : index
    %c0_36 = arith.constant 0 : index
    %c0_37 = arith.constant 0 : index
    %42 = vector.load %arg4[%c2, %c0_36, %c0_37] : memref<3x128x128xbf16, #tpu.memory_space<vmem>>, vector<1x128x128xbf16>
    %43 = vector.shape_cast %42 : vector<1x128x128xbf16> to vector<128x128xbf16>
    %c8_38 = arith.constant 8 : index
    %c0_39 = arith.constant 0 : index
    %44 = tpu.strided_load %arg11[%c8_38, %c0_39] {strides = array<i32: 2, 1>} : memref<56x128xf32, #tpu.memory_space<vmem>>, vector<24x128xf32>
    %45 = arith.truncf %44 : vector<24x128xf32> to vector<24x128xbf16>
    %cst_40 = arith.constant dense<0.000000e+00> : vector<24x128xf32>
    %46 = tpu.matmul %45, %43, %cst_40 {dimension_numbers = #tpu.dot_dimension_numbers<[1], [0], [0], [1], [0, 0, 1, 1], [], []>} : vector<24x128xbf16>, vector<128x128xbf16>, vector<24x128xf32> -> vector<24x128xf32>
    %47 = arith.addf %37, %46 : vector<24x128xf32>
    %c9 = arith.constant 9 : index
    %c0_41 = arith.constant 0 : index
    %48 = tpu.strided_load %arg11[%c9, %c0_41] {strides = array<i32: 2, 1>} : memref<56x128xf32, #tpu.memory_space<vmem>>, vector<24x128xf32>
    %49 = arith.truncf %48 : vector<24x128xf32> to vector<24x128xbf16>
    %cst_42 = arith.constant dense<0.000000e+00> : vector<24x128xf32>
    %50 = tpu.matmul %49, %43, %cst_42 {dimension_numbers = #tpu.dot_dimension_numbers<[1], [0], [0], [1], [0, 0, 1, 1], [], []>} : vector<24x128xbf16>, vector<128x128xbf16>, vector<24x128xf32> -> vector<24x128xf32>
    %51 = arith.addf %41, %50 : vector<24x128xf32>
    %52 = arith.maximumf %47, %51 : vector<24x128xf32>
    %c0_43 = arith.constant 0 : index
    %c0_44 = arith.constant 0 : index
    %53 = vector.load %arg5[%c0_43, %c0_44] : memref<1x128xf32, #tpu.memory_space<vmem>>, vector<1x128xf32>
    %54 = vector.broadcast %53 : vector<1x128xf32> to vector<24x128xf32>
    %55 = arith.addf %52, %54 : vector<24x128xf32>
    %cst_45 = arith.constant 0.000000e+00 : f32
    %56 = vector.broadcast %cst_45 : f32 to vector<24x128xf32>
    %57 = arith.maximumf %55, %56 : vector<24x128xf32>
    %58 = vector.broadcast %19 : vector<24x1xf32> to vector<24x128xf32>
    %59 = arith.mulf %57, %58 : vector<24x128xf32>
    %cst_46 = arith.constant 0.000000e+00 : f32
    %60 = vector.broadcast %cst_46 : f32 to vector<8x128xf32>
    %c0_47 = arith.constant 0 : index
    %c0_48 = arith.constant 0 : index
    %61 = vector.load %arg12[%c0_47, %c0_48] : memref<32x128xf32, #tpu.memory_space<vmem>>, vector<8x128xf32>
    tpu.vector_store %arg12[%c0_47, %c0_48], %60 {strides = array<i32>} : memref<32x128xf32, #tpu.memory_space<vmem>>, vector<8x128xf32>,
    %c8_49 = arith.constant 8 : index
    %c0_50 = arith.constant 0 : index
    %62 = vector.load %arg12[%c8_49, %c0_50] : memref<32x128xf32, #tpu.memory_space<vmem>>, vector<24x128xf32>
    tpu.vector_store %arg12[%c8_49, %c0_50], %59 {strides = array<i32>} : memref<32x128xf32, #tpu.memory_space<vmem>>, vector<24x128xf32>,
    %cst_51 = arith.constant 0.000000e+00 : f32
    %63 = vector.broadcast %cst_51 : f32 to vector<12x256xf32>
    %cst_52 = arith.constant 0.000000e+00 : f32
    %64 = vector.broadcast %cst_52 : f32 to vector<12x256xf32>
    %c0_53 = arith.constant 0 : index
    %c0_54 = arith.constant 0 : index
    %c0_55 = arith.constant 0 : index
    %65 = vector.load %arg6[%c0_53, %c0_54, %c0_55] : memref<3x128x256xbf16, #tpu.memory_space<vmem>>, vector<1x128x256xbf16>
    %66 = vector.shape_cast %65 : vector<1x128x256xbf16> to vector<128x256xbf16>
    %c6_56 = arith.constant 6 : index
    %c0_57 = arith.constant 0 : index
    %67 = tpu.strided_load %arg12[%c6_56, %c0_57] {strides = array<i32: 2, 1>} : memref<32x128xf32, #tpu.memory_space<vmem>>, vector<12x128xf32>
    %68 = arith.truncf %67 : vector<12x128xf32> to vector<12x128xbf16>
    %cst_58 = arith.constant dense<0.000000e+00> : vector<12x256xf32>
    %69 = tpu.matmul %68, %66, %cst_58 {dimension_numbers = #tpu.dot_dimension_numbers<[1], [0], [0], [1], [0, 0, 1, 1], [], []>} : vector<12x128xbf16>, vector<128x256xbf16>, vector<12x256xf32> -> vector<12x256xf32>
    %70 = arith.addf %63, %69 : vector<12x256xf32>
    %c7_59 = arith.constant 7 : index
    %c0_60 = arith.constant 0 : index
    %71 = tpu.strided_load %arg12[%c7_59, %c0_60] {strides = array<i32: 2, 1>} : memref<32x128xf32, #tpu.memory_space<vmem>>, vector<12x128xf32>
    %72 = arith.truncf %71 : vector<12x128xf32> to vector<12x128xbf16>
    %cst_61 = arith.constant dense<0.000000e+00> : vector<12x256xf32>
    %73 = tpu.matmul %72, %66, %cst_61 {dimension_numbers = #tpu.dot_dimension_numbers<[1], [0], [0], [1], [0, 0, 1, 1], [], []>} : vector<12x128xbf16>, vector<128x256xbf16>, vector<12x256xf32> -> vector<12x256xf32>
    %74 = arith.addf %64, %73 : vector<12x256xf32>
    %c1_62 = arith.constant 1 : index
    %c0_63 = arith.constant 0 : index
    %c0_64 = arith.constant 0 : index
    %75 = vector.load %arg6[%c1_62, %c0_63, %c0_64] : memref<3x128x256xbf16, #tpu.memory_space<vmem>>, vector<1x128x256xbf16>
    %76 = vector.shape_cast %75 : vector<1x128x256xbf16> to vector<128x256xbf16>
    %c7_65 = arith.constant 7 : index
    %c0_66 = arith.constant 0 : index
    %77 = tpu.strided_load %arg12[%c7_65, %c0_66] {strides = array<i32: 2, 1>} : memref<32x128xf32, #tpu.memory_space<vmem>>, vector<12x128xf32>
    %78 = arith.truncf %77 : vector<12x128xf32> to vector<12x128xbf16>
    %cst_67 = arith.constant dense<0.000000e+00> : vector<12x256xf32>
    %79 = tpu.matmul %78, %76, %cst_67 {dimension_numbers = #tpu.dot_dimension_numbers<[1], [0], [0], [1], [0, 0, 1, 1], [], []>} : vector<12x128xbf16>, vector<128x256xbf16>, vector<12x256xf32> -> vector<12x256xf32>
    %80 = arith.addf %70, %79 : vector<12x256xf32>
    %c8_68 = arith.constant 8 : index
    %c0_69 = arith.constant 0 : index
    %81 = tpu.strided_load %arg12[%c8_68, %c0_69] {strides = array<i32: 2, 1>} : memref<32x128xf32, #tpu.memory_space<vmem>>, vector<12x128xf32>
    %82 = arith.truncf %81 : vector<12x128xf32> to vector<12x128xbf16>
    %cst_70 = arith.constant dense<0.000000e+00> : vector<12x256xf32>
    %83 = tpu.matmul %82, %76, %cst_70 {dimension_numbers = #tpu.dot_dimension_numbers<[1], [0], [0], [1], [0, 0, 1, 1], [], []>} : vector<12x128xbf16>, vector<128x256xbf16>, vector<12x256xf32> -> vector<12x256xf32>
    %84 = arith.addf %74, %83 : vector<12x256xf32>
    %c2_71 = arith.constant 2 : index
    %c0_72 = arith.constant 0 : index
    %c0_73 = arith.constant 0 : index
    %85 = vector.load %arg6[%c2_71, %c0_72, %c0_73] : memref<3x128x256xbf16, #tpu.memory_space<vmem>>, vector<1x128x256xbf16>
    %86 = vector.shape_cast %85 : vector<1x128x256xbf16> to vector<128x256xbf16>
    %c8_74 = arith.constant 8 : index
    %c0_75 = arith.constant 0 : index
    %87 = tpu.strided_load %arg12[%c8_74, %c0_75] {strides = array<i32: 2, 1>} : memref<32x128xf32, #tpu.memory_space<vmem>>, vector<12x128xf32>
    %88 = arith.truncf %87 : vector<12x128xf32> to vector<12x128xbf16>
    %cst_76 = arith.constant dense<0.000000e+00> : vector<12x256xf32>
    %89 = tpu.matmul %88, %86, %cst_76 {dimension_numbers = #tpu.dot_dimension_numbers<[1], [0], [0], [1], [0, 0, 1, 1], [], []>} : vector<12x128xbf16>, vector<128x256xbf16>, vector<12x256xf32> -> vector<12x256xf32>
    %90 = arith.addf %80, %89 : vector<12x256xf32>
    %c9_77 = arith.constant 9 : index
    %c0_78 = arith.constant 0 : index
    %91 = tpu.strided_load %arg12[%c9_77, %c0_78] {strides = array<i32: 2, 1>} : memref<32x128xf32, #tpu.memory_space<vmem>>, vector<12x128xf32>
    %92 = arith.truncf %91 : vector<12x128xf32> to vector<12x128xbf16>
    %cst_79 = arith.constant dense<0.000000e+00> : vector<12x256xf32>
    %93 = tpu.matmul %92, %86, %cst_79 {dimension_numbers = #tpu.dot_dimension_numbers<[1], [0], [0], [1], [0, 0, 1, 1], [], []>} : vector<12x128xbf16>, vector<128x256xbf16>, vector<12x256xf32> -> vector<12x256xf32>
    %94 = arith.addf %84, %93 : vector<12x256xf32>
    %95 = arith.maximumf %90, %94 : vector<12x256xf32>
    %c0_80 = arith.constant 0 : index
    %c0_81 = arith.constant 0 : index
    %96 = vector.load %arg7[%c0_80, %c0_81] : memref<1x256xf32, #tpu.memory_space<vmem>>, vector<1x256xf32>
    %97 = vector.broadcast %96 : vector<1x256xf32> to vector<12x256xf32>
    %98 = arith.addf %95, %97 : vector<12x256xf32>
    %cst_82 = arith.constant 0.000000e+00 : f32
    %99 = vector.broadcast %cst_82 : f32 to vector<12x256xf32>
    %100 = arith.maximumf %98, %99 : vector<12x256xf32>
    %c0_83 = arith.constant 0 : index
    %c0_84 = arith.constant 0 : index
    %101 = vector.load %arg10[%c0_83, %c0_84] : memref<12x256xf32, #tpu.memory_space<vmem>>, vector<12x256xf32>
    tpu.vector_store %arg10[%c0_83, %c0_84], %100 {strides = array<i32>} : memref<12x256xf32, #tpu.memory_space<vmem>>, vector<12x256xf32>,
    return
  }
  func.func @transform_0(%arg0: i32) -> (i32, i32, i32) {
    %c0_i32 = arith.constant 0 : i32
    %c0_i32_0 = arith.constant 0 : i32
    %c0_i32_1 = arith.constant 0 : i32
    return %c0_i32, %arg0, %c0_i32_0 : i32, i32, i32
  }
  func.func @transform_1(%arg0: i32) -> (i32, i32) {
    %c0_i32 = arith.constant 0 : i32
    %c0_i32_0 = arith.constant 0 : i32
    %c0_i32_1 = arith.constant 0 : i32
    return %c0_i32, %c0_i32_0 : i32, i32
  }
  func.func @transform_2(%arg0: i32) -> (i32, i32) {
    %c0_i32 = arith.constant 0 : i32
    %c0_i32_0 = arith.constant 0 : i32
    %c0_i32_1 = arith.constant 0 : i32
    return %c0_i32, %c0_i32_0 : i32, i32
  }
  func.func @transform_3(%arg0: i32) -> (i32, i32, i32) {
    %c0_i32 = arith.constant 0 : i32
    %c0_i32_0 = arith.constant 0 : i32
    %c0_i32_1 = arith.constant 0 : i32
    %c0_i32_2 = arith.constant 0 : i32
    return %c0_i32, %c0_i32_0, %c0_i32_1 : i32, i32, i32
  }
  func.func @transform_4(%arg0: i32) -> (i32, i32) {
    %c0_i32 = arith.constant 0 : i32
    %c0_i32_0 = arith.constant 0 : i32
    %c0_i32_1 = arith.constant 0 : i32
    return %c0_i32, %c0_i32_0 : i32, i32
  }
  func.func @transform_5(%arg0: i32) -> (i32, i32, i32) {
    %c0_i32 = arith.constant 0 : i32
    %c0_i32_0 = arith.constant 0 : i32
    %c0_i32_1 = arith.constant 0 : i32
    %c0_i32_2 = arith.constant 0 : i32
    return %c0_i32, %c0_i32_0, %c0_i32_1 : i32, i32, i32
  }
  func.func @transform_6(%arg0: i32) -> (i32, i32) {
    %c0_i32 = arith.constant 0 : i32
    %c0_i32_0 = arith.constant 0 : i32
    %c0_i32_1 = arith.constant 0 : i32
    return %c0_i32, %c0_i32_0 : i32, i32
  }
  func.func @transform_7(%arg0: i32) -> (i32, i32) {
    %c0_i32 = arith.constant 0 : i32
    %c0_i32_0 = arith.constant 0 : i32
    %c0_i32_1 = arith.constant 0 : i32
    return %c0_i32, %c0_i32_0 : i32, i32
  }
  func.func @transform_8(%arg0: i32) -> (i32, i32) {
    %c0_i32 = arith.constant 0 : i32
    %c0_i32_0 = arith.constant 0 : i32
    %c0_i32_1 = arith.constant 0 : i32
    return %c0_i32, %c0_i32_0 : i32, i32
  }
  func.func @transform_9(%arg0: i32) -> (i32, i32) {
    %c0_i32 = arith.constant 0 : i32
    %c0_i32_0 = arith.constant 0 : i32
    return %arg0, %c0_i32 : i32, i32
  }
}

</mosaic_0001>

<bundles_post_ra>
// kernel: cnn_network_uci_forward.1
= control target key start
LH: loop header
LB: loop body
LE: loop exit
PB: predicated region body
PF: predicated region fallthrough
CT: control target
= control target key end

     0   :  { %v1989_v0 = vmov 0.0   ;;  %vm1990_vm0 = vmmov 0   ;;  %v1991_v3 = vmov 0   ;;  %vm86_vm1 = vcmask 523264   ;;  %s2572_s1 = inlined_call_operand.vmem [shape: bf16[64,128], index: 1, kind: input, shape index: {}]   ;;  %s2573_s0 = inlined_call_operand.vmem [shape: bf16[2,48,64], index: 0, kind: input, shape index: {}]   ;;  %s2574_s7 = inlined_call_operand.vmem [shape: f32[48,1], index: 7, kind: input, shape index: {}]   ;;  %s2575_s8 = inlined_call_operand.vmem [shape: f32[24,1], index: 8, kind: input, shape index: {}]   ;;  %s2576_s3 = inlined_call_operand.vmem [shape: bf16[3,128,128], index: 3, kind: input, shape index: {}]   ;;  %s2577_s2 = inlined_call_operand.vmem [shape: f32[1,128], index: 2, kind: input, shape index: {}]   ;;  %s2578_s5 = inlined_call_operand.vmem [shape: bf16[3,128,256], index: 5, kind: input, shape index: {}]   ;;  %s2579_s4 = inlined_call_operand.vmem [shape: f32[1,128], index: 4, kind: input, shape index: {}]   ;;  %s2580_s6 = inlined_call_operand.vmem [shape: f32[1,256], index: 6, kind: input, shape index: {}]   ;;  %s2581_s9 = inlined_call_operand.vmem [shape: f32[12,256], index: 9, kind: output, shape index: {}]  }
   0x1   :  { %1718 = vmatprep.subr.bf16.mxu0 %v1989_v0  ;;  %308 = vst [vmem:[#allocation2] sm:$0xff] %v1989_v0  ;;  %872 = vst [vmem:[#allocation3] sm:$0xff] %v1989_v0  ;;  %1738 = vmatprep.subr.bf16.mxu1 %v1989_v0  ;;  %v1883_v1 = vld [vmem:[%s2572_s1 + $0x18] sm:$0xff]   ;;  %v1884_v2 = vld [vmem:[%s2572_s1 + $0x10] sm:$0xff]  }
   0x2   :  { %1726 = vmatprep.mubr.msk.bf16.mxu0 %vm1990_vm0, %v1989_v0  ;;  %1746 = vmatprep.mubr.msk.bf16.mxu1 %vm1990_vm0, %v1989_v0  ;;  %v1885_v4 = vld [vmem:[%s2572_s1 + $0x8] sm:$0xff]   ;;  %v1886_v5 = vld [vmem:[%s2572_s1] sm:$0xff]   ;;  %v268_v7 = vld [vmem:[%s2574_s7 + $0x10] sm:$0xff] }
   0x3   :  { %1719 = vmatpush3.bf16.msra.mxu0 %v1883_v1  ;;  %1739 = vmatpush3.bf16.msra.mxu1 %v1883_v1  ;;  %v266_v6 = vld [vmem:[%s2574_s7] sm:$0xff]  ;;  %v1888_v9 = vld [vmem:[%s2573_s0 + $0x18] sm:$0xff]   ;;  %v267_v10 = vld [vmem:[%s2574_s7 + $0x8] sm:$0xff] }
   0x4   :  { %1720 = vmatprep.subr.bf16.mxu0 %v1989_v0  ;;  %1740 = vmatprep.subr.bf16.mxu1 %v1989_v0  ;;  %v1887_v8 = vld [vmem:[%s2573_s0] sm:$0xff]   ;;  %v269_v11 = vld [vmem:[%s2574_s7 + $0x18] sm:$0xff]  ;;  %v271_v13 = vld [vmem:[%s2574_s7 + $0x28] sm:$0xff] }
   0x5   :  { %1881 = vset.pattern.permute.xlu0 %v1991_v3  ;;  %1882 = vset.pattern.permute.xlu1 %v1991_v3  ;;  %v270_v12 = vld [vmem:[%s2574_s7 + $0x20] sm:$0xff]  ;;  %v1889_v14 = vld [vmem:[%s2573_s0 + $0x8] sm:$0xff]   ;;  %v317_v18 = vld [vmem:[%s2575_s8 + $0x10] sm:$0xff] }
   0x6   :  { %274 = vperm.xlu0 %1881, %v266_v6   ;;  %284 = vperm.xlu1 %1882, %v268_v7   ;;  %v1890_v15 = vld [vmem:[%s2573_s0 + $0x20] sm:$0xff]   ;;  %v316_v17 = vld [vmem:[%s2575_s8 + $0x8] sm:$0xff]  ;;  %v1891_v19 = vld [vmem:[%s2573_s0 + $0x10] sm:$0xff]  }
   0x7   :  { %1721 = vmatpush3.bf16.msra.mxu0 %v1884_v2  ;;  %1741 = vmatpush3.bf16.msra.mxu1 %v1884_v2  ;;  %v315_v16 = vld [vmem:[%s2575_s8] sm:$0xff]  ;;  %v1892_v20 = vld [vmem:[%s2573_s0 + $0x28] sm:$0xff]   ;;  %v2116_v21 = vld [vmem:[%s2576_s3 + $0x78] sm:$0xff]  }
   0x8   :  { %1722 = vmatprep.subr.bf16.mxu0 %v1989_v0  ;;  %1742 = vmatprep.subr.bf16.mxu1 %v1989_v0  ;;  %v2121_v22 = vld [vmem:[%s2576_s3 + $0x38] sm:$0xff]   ;;  %v2130_v23 = vld [vmem:[%s2576_s3 + $0x70] sm:$0xff]   ;;  %v2144_v25 = vld [vmem:[%s2576_s3 + $0x68] sm:$0xff]  }
   0x9   :  { %v2135_v24 = vld [vmem:[%s2576_s3 + $0x30] sm:$0xff]   ;;  %v2149_v26 = vld [vmem:[%s2576_s3 + $0x28] sm:$0xff]   ;;  %v2158_v27 = vld [vmem:[%s2576_s3 + $0x60] sm:$0xff]  }
   0xa   :  { %279 = vperm.xlu0 %1881, %v267_v10   ;;  %289 = vperm.xlu1 %1882, %v269_v11   ;;  %v2163_v28 = vld [vmem:[%s2576_s3 + $0x20] sm:$0xff]   ;;  %v2172_v29 = vld [vmem:[%s2576_s3 + $0x58] sm:$0xff]   ;;  %v2186_v31 = vld [vmem:[%s2576_s3 + $0x50] sm:$0xff]  }
   0xb   :  { %1723 = vmatpush3.bf16.msra.mxu0 %v1885_v4  ;;  %1743 = vmatpush3.bf16.msra.mxu1 %v1885_v4  ;;  %v2177_v30 = vld [vmem:[%s2576_s3 + $0x18] sm:$0xff]   ;;  %v2191_v32 = vld [vmem:[%s2576_s3 + $0x10] sm:$0xff]   ;;  %v2200_v33 = vld [vmem:[%s2576_s3 + $0x48] sm:$0xff]  }
   0xc   :  { %1724 = vmatprep.subr.bf16.mxu0 %v1989_v0  ;;  %1744 = vmatprep.subr.bf16.mxu1 %v1989_v0  ;;  %v2205_v34 = vld [vmem:[%s2576_s3 + $0x8] sm:$0xff]   ;;  %v2213_v35 = vld [vmem:[%s2576_s3 + $0x40] sm:$0xff]  }
   0xd   :  { %v2218_v36 = vld [vmem:[%s2576_s3] sm:$0xff]  }
   0xe   :  { %294 = vperm.xlu0 %1881, %v270_v12   ;;  %299 = vperm.xlu1 %1882, %v271_v13   ;;  %v1506_v39 = vld [vmem:[%s2577_s2] ss:$0 sm:$0xff] }
   0xf   :  { %1725 = vmatpush3.bf16.msra.mxu0 %v1886_v5  ;;  %1745 = vmatpush3.bf16.msra.mxu1 %v1886_v5 }
  0x10   :  { %1758 = vmatprep.subr.bf16.mxu0 %v2116_v21  ;;  %1778 = vmatprep.subr.bf16.mxu1 %v2121_v22 }
  0x12   :  { %1727 = vmatmul.mubr.msk.bf16.vlgmr.msra.gmra.mxu0 %vm86_vm1, %v1887_v8  ;;  %1747 = vmatmul.mubr.msk.bf16.vlgmr.msra.gmra.mxu1 %vm86_vm1, %v1888_v9 }
  0x13   :  { %1730 = vmatprep.mubr.msk.bf16.mxu0 %vm1990_vm0, %v1989_v0  ;;  %1750 = vmatprep.mubr.msk.bf16.mxu1 %vm1990_vm0, %v1989_v0 }
  0x14   :  { %856 = vperm.xlu0 %1881, %v315_v16   ;;  %861 = vperm.xlu1 %1882, %v316_v17  }
  0x15   :  { %1759 = vmatpush3.bf16.msra.mxu0 %v2116_v21  ;;  %1779 = vmatpush3.bf16.msra.mxu1 %v2121_v22 }
  0x16   :  { %1760 = vmatprep.subr.bf16.mxu0 %v2130_v23  ;;  %1780 = vmatprep.subr.bf16.mxu1 %v2135_v24 }
  0x18   :  { %866 = vperm.xlu0 %1881, %v317_v18  }
  0x19   :  { %1761 = vmatpush3.bf16.msra.mxu0 %v2130_v23  ;;  %1781 = vmatpush3.bf16.msra.mxu1 %v2135_v24 }
  0x1a   :  { %1731 = vmatmul.mubr.msk.bf16.gmra.mxu0 %vm86_vm1, %v1889_v14  ;;  %1751 = vmatmul.mubr.msk.bf16.gmra.mxu1 %vm86_vm1, %v1890_v15 }
  0x1b   :  { %1734 = vmatprep.mubr.msk.bf16.mxu0 %vm1990_vm0, %v1989_v0  ;;  %1754 = vmatprep.mubr.msk.bf16.mxu1 %vm1990_vm0, %v1989_v0 }
  0x1c   :  { %1762 = vmatprep.subr.bf16.mxu0 %v2144_v25  ;;  %1782 = vmatprep.subr.bf16.mxu1 %v2149_v26 }
  0x1d   :  { %1763 = vmatpush3.bf16.msra.mxu0 %v2144_v25  ;;  %1783 = vmatpush3.bf16.msra.mxu1 %v2149_v26 }
  0x1e   :  { %1764 = vmatprep.subr.bf16.mxu0 %v2158_v27  ;;  %1784 = vmatprep.subr.bf16.mxu1 %v2163_v28 }
  0x21   :  { %1765 = vmatpush3.bf16.msra.mxu0 %v2158_v27  ;;  %1785 = vmatpush3.bf16.msra.mxu1 %v2163_v28 }
  0x22   :  { %1735 = vmatmul.mubr.msk.bf16.gmra.mxu0 %vm86_vm1, %v1891_v19  ;;  %1755 = vmatmul.mubr.msk.bf16.gmra.mxu1 %vm86_vm1, %v1892_v20 }
  0x23   :  { %1766 = vmatprep.subr.bf16.mxu0 %v2172_v29  ;;  %1786 = vmatprep.subr.bf16.mxu1 %v2177_v30 }
  0x25   :  { %1767 = vmatpush3.bf16.msra.mxu0 %v2172_v29  ;;  %1787 = vmatpush3.bf16.msra.mxu1 %v2177_v30 }
  0x26   :  { %1768 = vmatprep.subr.bf16.mxu0 %v2186_v31  ;;  %1788 = vmatprep.subr.bf16.mxu1 %v2191_v32 }
  0x29   :  { %1769 = vmatpush3.bf16.msra.mxu0 %v2186_v31  ;;  %1789 = vmatpush3.bf16.msra.mxu1 %v2191_v32 }
  0x2a   :  { %1770 = vmatprep.subr.bf16.mxu0 %v2200_v33  ;;  %1790 = vmatprep.subr.bf16.mxu1 %v2205_v34 }
  0x2d   :  { %1771 = vmatpush3.bf16.msra.mxu0 %v2200_v33  ;;  %1791 = vmatpush3.bf16.msra.mxu1 %v2205_v34 }
  0x2e   :  { %1772 = vmatprep.subr.bf16.mxu0 %v2213_v35  ;;  %1792 = vmatprep.subr.bf16.mxu1 %v2218_v36 }
  0x31   :  { %1773 = vmatpush3.bf16.msra.mxu0 %v2213_v35  ;;  %1793 = vmatpush3.bf16.msra.mxu1 %v2218_v36 }
  0x32   :  { %1798 = vmatprep.subr.bf16.mxu0 %v2116_v21  ;;  %1818 = vmatprep.subr.bf16.mxu1 %v2121_v22 }
  0x81   :  { %v275_v44 = vpop.permute.xlu0 %274  ;;  %v285_v60 = vpop.permute.xlu1 %284 }
  0x85   :  { %v280_v55 = vpop.permute.xlu0 %279  ;;  %v290_v10 = vpop.permute.xlu1 %289 }
  0x89   :  { %v295_v19 = vpop.permute.xlu0 %294 }
  0xd2   :  { %v130_v37 = vpop.f32.mrf.mxu0  ;;  %v218_v38 = vpop.f32.mrf.mxu1 }
  0xd3   :  { %v241_v40 = vmax.f32 %v130_v37, %v218_v38 }
  0xd4   :  { %v1728_v41 = vpop.f32.mrf.mxu0  ;;  %v1748_v42 = vpop.f32.mrf.mxu1 }
  0xd5   :  { %v254_v43 = vadd.f32 %v1506_v39, %v241_v40 }
  0xd6   :  { %v133_v45 = vpop.f32.mrf.mxu0  ;;  %v221_v46 = vpop.f32.mrf.mxu1 }
  0xd7   :  { %v260_v47 = vmax.f32 %v254_v43, 0.0  ;;  %v242_v48 = vmax.f32 %v133_v45, %v221_v46 }
  0xd8   :  { %v1729_v49 = vpop.f32.mrf.mxu0  ;;  %v1749_v50 = vpop.f32.mrf.mxu1 }
  0xd9   :  { %v302_v51 = vmul.f32 %v275_v44, %v260_v47  ;;  %v255_v52 = vadd.f32 %v1506_v39, %v242_v48  ;;  %v300_v44 = vpop.permute.xlu1 %299 }
  0xda   :  { %v138_v53 = vpop.f32.mrf.mxu0  ;;  %v226_v54 = vpop.f32.mrf.mxu1 }
  0xdb   :  { %309 = vst [vmem:[#allocation2 + $0x8] sm:$0xff] %v302_v51  ;;  %v261_v56 = vmax.f32 %v255_v52, 0.0  ;;  %v243_v57 = vmax.f32 %v138_v53, %v226_v54 }
  0xdc   :  { %v1732_v58 = vpop.f32.mrf.mxu0  ;;  %v1752_v59 = vpop.f32.mrf.mxu1 }
  0xdd   :  { %v303_v61 = vmul.f32 %v280_v55, %v261_v56  ;;  %v256_v62 = vadd.f32 %v1506_v39, %v243_v57  ;;  %v1919_v58 = vld [vmem:[%s2578_s5 + $0xf4] ss:$8 sps:$4 sm:$0xff]   ;;  %v2297_v59 = vld [vmem:[%s2578_s5 + $0x70] ss:$8 sps:$4 sm:$0xff]  }
  0xde   :  { %v141_v63 = vpop.f32.mrf.mxu0  ;;  %v229_v0 = vpop.f32.mrf.mxu1 }
  0xdf   :  { %310 = vst [vmem:[#allocation2 + $0x10] sm:$0xff] %v303_v61  ;;  %v262_v1 = vmax.f32 %v256_v62, 0.0  ;;  %v244_v2 = vmax.f32 %v141_v63, %v229_v0  ;;  %v2305_v61 = vld [vmem:[%s2578_s5 + $0xe0] ss:$8 sps:$4 sm:$0xff]   ;;  %v2310_v62 = vld [vmem:[%s2578_s5 + $0xe4] ss:$8 sps:$4 sm:$0xff]  }
  0xe0   :  { %v1733_v4 = vpop.f32.mrf.mxu0  ;;  %v1753_v5 = vpop.f32.mrf.mxu1  ;;  %v2316_v63 = vld [vmem:[%s2578_s5 + $0x60] ss:$8 sps:$4 sm:$0xff]   ;;  %v2323_v0 = vld [vmem:[%s2578_s5 + $0x64] ss:$8 sps:$4 sm:$0xff]  }
  0xe1   :  { %v304_v6 = vmul.f32 %v285_v60, %v262_v1  ;;  %v257_v7 = vadd.f32 %v1506_v39, %v244_v2  ;;  %v1922_v60 = vld [vmem:[%s2578_s5 + $0x74] ss:$8 sps:$4 sm:$0xff]   ;;  %v2341_v4 = vld [vmem:[%s2578_s5 + $0xd0] ss:$8 sps:$4 sm:$0xff]  }
  0xe2   :  { %v146_v8 = vpop.f32.mrf.mxu0  ;;  %v234_v9 = vpop.f32.mrf.mxu1  ;;  %v2331_v1 = vld [vmem:[%s2578_s5 + $0xd4] ss:$8 sps:$4 sm:$0xff]   ;;  %v2346_v5 = vld [vmem:[%s2578_s5 + $0x50] ss:$8 sps:$4 sm:$0xff]  }
  0xe3   :  { %311 = vst [vmem:[#allocation2 + $0x18] sm:$0xff] %v304_v6  ;;  %v263_v11 = vmax.f32 %v257_v7, 0.0  ;;  %v245_v12 = vmax.f32 %v146_v8, %v234_v9  ;;  %v2336_v2 = vld [vmem:[%s2578_s5 + $0x54] ss:$8 sps:$4 sm:$0xff]   ;;  %v2355_v6 = vld [vmem:[%s2578_s5 + $0xc4] ss:$8 sps:$4 sm:$0xff]  }
  0xe4   :  { %v1736_v13 = vpop.f32.mrf.mxu0  ;;  %v1756_v14 = vpop.f32.mrf.mxu1  ;;  %v2360_v7 = vld [vmem:[%s2578_s5 + $0x44] ss:$8 sps:$4 sm:$0xff]   ;;  %v2365_v8 = vld [vmem:[%s2578_s5 + $0xc0] ss:$8 sps:$4 sm:$0xff]  }
  0xe5   :  { %v305_v15 = vmul.f32 %v290_v10, %v263_v11  ;;  %v258_v16 = vadd.f32 %v1506_v39, %v245_v12  ;;  %v2370_v9 = vld [vmem:[%s2578_s5 + $0x40] ss:$8 sps:$4 sm:$0xff]   ;;  %v2379_v10 = vld [vmem:[%s2578_s5 + $0xb4] ss:$8 sps:$4 sm:$0xff]   ;;  %v2389_v12 = vld [vmem:[%s2578_s5 + $0xb0] ss:$8 sps:$4 sm:$0xff]  }
  0xe6   :  { %v149_v17 = vpop.f32.mrf.mxu0  ;;  %v237_v18 = vpop.f32.mrf.mxu1  ;;  %v343_v46 = vld [vmem:[#allocation2 + $0x7] ss:$2 sm:$0xff]  ;;  %v335_v48 = vld [vmem:[#allocation2 + $0x6] ss:$2 sm:$0xff] }
  0xe7   :  { %312 = vst [vmem:[#allocation2 + $0x20] sm:$0xff] %v305_v15  ;;  %v264_v20 = vmax.f32 %v258_v16, 0.0  ;;  %v246_v37 = vmax.f32 %v149_v17, %v237_v18  ;;  %v560_v57 = vld [vmem:[#allocation2 + $0x8] ss:$2 sm:$0xff] }
  0xe8   :  { %v1737_v38 = vpop.f32.mrf.mxu0  ;;  %v1757_v40 = vpop.f32.mrf.mxu1  ;;  %v2384_v11 = vld [vmem:[%s2578_s5 + $0x34] ss:$8 sps:$4 sm:$0xff]   ;;  %v2394_v13 = vld [vmem:[%s2578_s5 + $0x30] ss:$8 sps:$4 sm:$0xff]   ;;  %v2403_v14 = vld [vmem:[%s2578_s5 + $0xa4] ss:$8 sps:$4 sm:$0xff]  }
  0xe9   :  { %v306_v41 = vmul.f32 %v295_v19, %v264_v20  ;;  %v259_v42 = vadd.f32 %v1506_v39, %v246_v37  ;;  %v2408_v15 = vld [vmem:[%s2578_s5 + $0x24] ss:$8 sps:$4 sm:$0xff]   ;;  %v2413_v16 = vld [vmem:[%s2578_s5 + $0xa0] ss:$8 sps:$4 sm:$0xff]   ;;  %v2427_v18 = vld [vmem:[%s2578_s5 + $0x94] ss:$8 sps:$4 sm:$0xff]  }
  0xea   :  { %v2418_v17 = vld [vmem:[%s2578_s5 + $0x20] ss:$8 sps:$4 sm:$0xff]   ;;  %v2432_v19 = vld [vmem:[%s2578_s5 + $0x14] ss:$8 sps:$4 sm:$0xff]   ;;  %v2437_v20 = vld [vmem:[%s2578_s5 + $0x90] ss:$8 sps:$4 sm:$0xff]  }
  0xeb   :  { %313 = vst [vmem:[#allocation2 + $0x28] sm:$0xff] %v306_v41  ;;  %v265_v43 = vmax.f32 %v259_v42, 0.0  ;;  %v2442_v37 = vld [vmem:[%s2578_s5 + $0x10] ss:$8 sps:$4 sm:$0xff]   ;;  %v2449_v38 = vld [vmem:[%s2578_s5 + $0x84] ss:$8 sps:$4 sm:$0xff]  }
  0xec   :  { %v2454_v40 = vld [vmem:[%s2578_s5 + $0x4] ss:$8 sps:$4 sm:$0xff]   ;;  %v2461_v41 = vld [vmem:[%s2578_s5 + $0x80] ss:$8 sps:$4 sm:$0xff]  }
  0xed   :  { %v307_v45 = vmul.f32 %v300_v44, %v265_v43  ;;  %v2466_v42 = vld [vmem:[%s2578_s5] ss:$8 sps:$4 sm:$0xff]  }
  0xee   :  { %v345_v47 = vld [vmem:[#allocation2 + $0x17] ss:$2 sm:$0xff]  ;;  %v337_v49 = vld [vmem:[#allocation2 + $0x16] ss:$2 sm:$0xff] }
  0xef   :  { %314 = vst [vmem:[#allocation2 + $0x30] sm:$0xff] %v307_v45  ;;  %v348_v50 = vpack.c.bf16 %v345_v47, %v343_v46  ;;  %v340_v51 = vpack.c.bf16 %v337_v49, %v335_v48  ;;  %v562_v54 = vld [vmem:[#allocation2 + $0x18] ss:$2 sm:$0xff] }
  0xf0   :  { %v565_v39 = vpack.c.bf16 %v562_v54, %v560_v57 }
  0xf1   :  { %1774 = vmatprep.mubr.bf16.mxu0 %v348_v50  ;;  %1794 = vmatprep.mubr.bf16.mxu1 %v340_v51 }
  0xf6   :  { %v347_v52 = vld [vmem:[#allocation2 + $0x27] ss:$2 sm:$0xff]  ;;  %v339_v53 = vld [vmem:[#allocation2 + $0x26] ss:$2 sm:$0xff] }
  0xf7   :  { %v349_v55 = vpack.c.bf16 %v347_v52, %v347_v52  ;;  %v341_v56 = vpack.c.bf16 %v339_v53, %v339_v53 }
  0xf9   :  { %1775 = vmatmul.mubr.bf16.vlgmr.msra.gmra.mxu0 %v349_v55  ;;  %1795 = vmatmul.mubr.bf16.vlgmr.msra.gmra.mxu1 %v341_v56 }
  0xfa   :  { %1799 = vmatpush3.bf16.msra.mxu0 %v2116_v21  ;;  %1819 = vmatpush3.bf16.msra.mxu1 %v2121_v22  ;;  %v1909_v21 = vld [vmem:[%s2576_s3 + $0xb8] sm:$0xff]   ;;  %v564_v22 = vld [vmem:[#allocation2 + $0x28] ss:$2 sm:$0xff] }
  0xfb   :  { %1814 = vmatprep.mubr.bf16.mxu0 %v565_v39  ;;  %1834 = vmatprep.mubr.bf16.mxu1 %v348_v50 }
  0xfc   :  { %1800 = vmatprep.subr.bf16.mxu0 %v2130_v23  ;;  %1820 = vmatprep.subr.bf16.mxu1 %v2135_v24 }
  0xfe   :  { %1801 = vmatpush3.bf16.msra.mxu0 %v2130_v23  ;;  %1821 = vmatpush3.bf16.msra.mxu1 %v2135_v24  ;;  %v782_v23 = vld [vmem:[#allocation2 + $0x19] ss:$2 sm:$0xff]  ;;  %v566_v24 = vpack.c.bf16 %v564_v22, %v564_v22 }
  0xff   :  { %1802 = vmatprep.subr.bf16.mxu0 %v2144_v25  ;;  %1822 = vmatprep.subr.bf16.mxu1 %v2149_v26 }
 0x102   :  { %1803 = vmatpush3.bf16.msra.mxu0 %v2144_v25  ;;  %1823 = vmatpush3.bf16.msra.mxu1 %v2149_v26  ;;  %v780_v25 = vld [vmem:[#allocation2 + $0x9] ss:$2 sm:$0xff] }
 0x103   :  { %1804 = vmatprep.subr.bf16.mxu0 %v2158_v27  ;;  %1824 = vmatprep.subr.bf16.mxu1 %v2163_v28  ;;  %v1910_v26 = vld [vmem:[%s2576_s3 + $0xb0] sm:$0xff]  }
 0x106   :  { %1805 = vmatpush3.bf16.msra.mxu0 %v2158_v27  ;;  %1825 = vmatpush3.bf16.msra.mxu1 %v2163_v28  ;;  %v785_v27 = vpack.c.bf16 %v782_v23, %v780_v25  ;;  %v1911_v28 = vld [vmem:[%s2576_s3 + $0xa8] sm:$0xff]  }
 0x107   :  { %1806 = vmatprep.subr.bf16.mxu0 %v2172_v29  ;;  %1826 = vmatprep.subr.bf16.mxu1 %v2177_v30 }
 0x10a   :  { %1807 = vmatpush3.bf16.msra.mxu0 %v2172_v29  ;;  %1827 = vmatpush3.bf16.msra.mxu1 %v2177_v30  ;;  %v1912_v29 = vld [vmem:[%s2576_s3 + $0xa0] sm:$0xff]   ;;  %v1913_v30 = vld [vmem:[%s2576_s3 + $0x98] sm:$0xff]  }
 0x10b   :  { %1808 = vmatprep.subr.bf16.mxu0 %v2186_v31  ;;  %1828 = vmatprep.subr.bf16.mxu1 %v2191_v32 }
 0x10e   :  { %1809 = vmatpush3.bf16.msra.mxu0 %v2186_v31  ;;  %1829 = vmatpush3.bf16.msra.mxu1 %v2191_v32  ;;  %v1914_v31 = vld [vmem:[%s2576_s3 + $0x90] sm:$0xff]   ;;  %v1915_v32 = vld [vmem:[%s2576_s3 + $0x88] sm:$0xff]  }
 0x10f   :  { %1810 = vmatprep.subr.bf16.mxu0 %v2200_v33  ;;  %1830 = vmatprep.subr.bf16.mxu1 %v2205_v34 }
 0x112   :  { %1811 = vmatpush3.bf16.msra.mxu0 %v2200_v33  ;;  %1831 = vmatpush3.bf16.msra.mxu1 %v2205_v34  ;;  %v1916_v33 = vld [vmem:[%s2576_s3 + $0x80] sm:$0xff]   ;;  %v784_v34 = vld [vmem:[#allocation2 + $0x29] ss:$2 sm:$0xff] }
 0x113   :  { %1812 = vmatprep.subr.bf16.mxu0 %v2213_v35  ;;  %1832 = vmatprep.subr.bf16.mxu1 %v2218_v36 }
 0x116   :  { %1813 = vmatpush3.bf16.msra.mxu0 %v2213_v35  ;;  %1833 = vmatpush3.bf16.msra.mxu1 %v2218_v36  ;;  %v786_v35 = vpack.c.bf16 %v784_v34, %v784_v34  ;;  %v2289_v36 = vld [vmem:[%s2578_s5 + $0xf0] ss:$8 sps:$4 sm:$0xff]  }
 0x117   :  { %1838 = vmatprep.subr.bf16.mxu0 %v1909_v21  ;;  %1858 = vmatprep.subr.bf16.mxu1 %v1909_v21 }
 0x119   :  { %1815 = vmatmul.mubr.bf16.vlgmr.msra.gmra.mxu0 %v566_v24  ;;  %1835 = vmatmul.mubr.bf16.vlgmr.msra.gmra.mxu1 %v349_v55 }
 0x11a   :  { %1839 = vmatpush3.bf16.msra.mxu0 %v1909_v21  ;;  %1854 = vmatprep.mubr.bf16.mxu0 %v565_v39 }
 0x11b   :  { %1859 = vmatpush3.bf16.msra.mxu1 %v1909_v21  ;;  %1874 = vmatprep.mubr.bf16.mxu1 %v785_v27 }
 0x11c   :  { %1840 = vmatprep.subr.bf16.mxu0 %v1910_v26  ;;  %1860 = vmatprep.subr.bf16.mxu1 %v1910_v26 }
 0x11e   :  { %1841 = vmatpush3.bf16.msra.mxu0 %v1910_v26 }
 0x11f   :  { %1861 = vmatpush3.bf16.msra.mxu1 %v1910_v26  ;;  %1842 = vmatprep.subr.bf16.mxu0 %v1911_v28 }
 0x120   :  { %1862 = vmatprep.subr.bf16.mxu1 %v1911_v28 }
 0x122   :  { %1843 = vmatpush3.bf16.msra.mxu0 %v1911_v28 }
 0x123   :  { %1863 = vmatpush3.bf16.msra.mxu1 %v1911_v28  ;;  %1844 = vmatprep.subr.bf16.mxu0 %v1912_v29 }
 0x124   :  { %1864 = vmatprep.subr.bf16.mxu1 %v1912_v29 }
 0x126   :  { %1845 = vmatpush3.bf16.msra.mxu0 %v1912_v29 }
 0x127   :  { %1865 = vmatpush3.bf16.msra.mxu1 %v1912_v29  ;;  %1846 = vmatprep.subr.bf16.mxu0 %v1913_v30 }
 0x128   :  { %1866 = vmatprep.subr.bf16.mxu1 %v1913_v30 }
 0x12a   :  { %1847 = vmatpush3.bf16.msra.mxu0 %v1913_v30 }
 0x12b   :  { %1867 = vmatpush3.bf16.msra.mxu1 %v1913_v30  ;;  %1848 = vmatprep.subr.bf16.mxu0 %v1914_v31  ;;  %v857_v30 = vpop.permute.xlu0 %856 }
 0x12c   :  { %1868 = vmatprep.subr.bf16.mxu1 %v1914_v31 }
 0x12e   :  { %1849 = vmatpush3.bf16.msra.mxu0 %v1914_v31 }
 0x12f   :  { %1869 = vmatpush3.bf16.msra.mxu1 %v1914_v31  ;;  %1850 = vmatprep.subr.bf16.mxu0 %v1915_v32  ;;  %v1563_v31 = vld [vmem:[%s2579_s4] ss:$0 sm:$0xff] }
 0x130   :  { %1870 = vmatprep.subr.bf16.mxu1 %v1915_v32 }
 0x132   :  { %1851 = vmatpush3.bf16.msra.mxu0 %v1915_v32 }
 0x133   :  { %1871 = vmatpush3.bf16.msra.mxu1 %v1915_v32  ;;  %1852 = vmatprep.subr.bf16.mxu0 %v1916_v33 }
 0x134   :  { %1872 = vmatprep.subr.bf16.mxu1 %v1916_v33 }
 0x136   :  { %1853 = vmatpush3.bf16.msra.mxu0 %v1916_v33 }
 0x137   :  { %1873 = vmatpush3.bf16.msra.mxu1 %v1916_v33  ;;  %999 = vmatprep.subr.bf16.mxu0 %v1919_v58 }
 0x138   :  { %1122 = vmatprep.subr.bf16.mxu1 %v1922_v60 }
 0x139   :  { %1855 = vmatmul.mubr.bf16.vlgmr.msra.gmra.mxu0 %v566_v24 }
 0x13a   :  { %1875 = vmatmul.mubr.bf16.vlgmr.msra.gmra.mxu1 %v786_v35  ;;  %1031 = vmatprep.mubr.bf16.mxu0 %v1991_v3 }
 0x13b   :  { %1154 = vmatprep.mubr.bf16.mxu1 %v1991_v3  ;;  %1000 = vmatpush1.bf16.msra.mxu0 %v2289_v36 }
 0x13c   :  { %1123 = vmatpush1.bf16.msra.mxu1 %v2297_v59  ;;  %1001 = vmatprep.subr.bf16.mxu0 %v2310_v62 }
 0x13d   :  { %1124 = vmatprep.subr.bf16.mxu1 %v2323_v0 }
 0x13f   :  { %1002 = vmatpush1.bf16.msra.mxu0 %v2305_v61 }
 0x140   :  { %1125 = vmatpush1.bf16.msra.mxu1 %v2316_v63  ;;  %1003 = vmatprep.subr.bf16.mxu0 %v2331_v1 }
 0x141   :  { %1126 = vmatprep.subr.bf16.mxu1 %v2336_v2 }
 0x143   :  { %1004 = vmatpush1.bf16.msra.mxu0 %v2341_v4 }
 0x144   :  { %1127 = vmatpush1.bf16.msra.mxu1 %v2346_v5  ;;  %1005 = vmatprep.subr.bf16.mxu0 %v2355_v6 }
 0x145   :  { %1128 = vmatprep.subr.bf16.mxu1 %v2360_v7 }
 0x147   :  { %1006 = vmatpush1.bf16.msra.mxu0 %v2365_v8 }
 0x148   :  { %1129 = vmatpush1.bf16.msra.mxu1 %v2370_v9  ;;  %1007 = vmatprep.subr.bf16.mxu0 %v2379_v10 }
 0x149   :  { %1130 = vmatprep.subr.bf16.mxu1 %v2384_v11 }
 0x14b   :  { %1008 = vmatpush1.bf16.msra.mxu0 %v2389_v12 }
 0x14c   :  { %1131 = vmatpush1.bf16.msra.mxu1 %v2394_v13  ;;  %1009 = vmatprep.subr.bf16.mxu0 %v2403_v14 }
 0x14d   :  { %1132 = vmatprep.subr.bf16.mxu1 %v2408_v15 }
 0x14f   :  { %1010 = vmatpush1.bf16.msra.mxu0 %v2413_v16 }
 0x150   :  { %1133 = vmatpush1.bf16.msra.mxu1 %v2418_v17  ;;  %1011 = vmatprep.subr.bf16.mxu0 %v2427_v18 }
 0x151   :  { %1134 = vmatprep.subr.bf16.mxu1 %v2432_v19 }
 0x153   :  { %1012 = vmatpush1.bf16.msra.mxu0 %v2437_v20 }
 0x154   :  { %1135 = vmatpush1.bf16.msra.mxu1 %v2442_v37  ;;  %1013 = vmatprep.subr.bf16.mxu0 %v2449_v38 }
 0x155   :  { %1136 = vmatprep.subr.bf16.mxu1 %v2454_v40 }
 0x157   :  { %1014 = vmatpush1.bf16.msra.mxu0 %v2461_v41 }
 0x158   :  { %1137 = vmatpush1.bf16.msra.mxu1 %v2466_v42  ;;  %1170 = vmatprep.subr.bf16.mxu0 %v1919_v58 }
 0x159   :  { %1213 = vmatprep.subr.bf16.mxu1 %v1922_v60 }
 0x1b9   :  { %v1776_v43 = vpop.f32.mrf.mxu0  ;;  %v1796_v44 = vpop.f32.mrf.mxu1 }
 0x1ba   :  { %v554_v39 = vadd.f32 %v1796_v44, %v1776_v43 }
 0x1bb   :  { %v449_v45 = vpop.f32.mrf.mxu0  ;;  %v545_v46 = vpop.f32.mrf.mxu1 }
 0x1bc   :  { %v546_v24 = vadd.f32 %v545_v46, %v449_v45 }
 0x1bd   :  { %v1777_v47 = vpop.f32.mrf.mxu0  ;;  %v1797_v48 = vpop.f32.mrf.mxu1 }
 0x1bf   :  { %v452_v49 = vpop.f32.mrf.mxu0  ;;  %v548_v50 = vpop.f32.mrf.mxu1 }
 0x1c0   :  { %v549_v60 = vadd.f32 %v548_v50, %v452_v49  ;;  %v862_v49 = vpop.permute.xlu1 %861 }
 0x1d9   :  { %v1816_v51 = vpop.f32.mrf.mxu0  ;;  %v1836_v52 = vpop.f32.mrf.mxu1 }
 0x1da   :  { %v658_v22 = vadd.f32 %v1836_v52, %v1816_v51 }
 0x1db   :  { %v601_v53 = vpop.f32.mrf.mxu0  ;;  %v649_v54 = vpop.f32.mrf.mxu1 }
 0x1dc   :  { %v650_v27 = vadd.f32 %v649_v54, %v601_v53 }
 0x1dd   :  { %v1817_v55 = vpop.f32.mrf.mxu0  ;;  %v1837_v56 = vpop.f32.mrf.mxu1 }
 0x1de   :  { %v867_v55 = vpop.permute.xlu0 %866 }
 0x1df   :  { %v604_v57 = vpop.f32.mrf.mxu0  ;;  %v652_v21 = vpop.f32.mrf.mxu1 }
 0x1e0   :  { %v653_v44 = vadd.f32 %v652_v21, %v604_v57 }
 0x1f9   :  { %v1856_v23 = vpop.f32.mrf.mxu0 }
 0x1fa   :  { %v778_v25 = vadd.f32 %v1856_v23, %v554_v39  ;;  %v1876_v26 = vpop.f32.mrf.mxu1 }
 0x1fb   :  { %v837_v28 = vadd.f32 %v1876_v26, %v658_v22  ;;  %v762_v29 = vpop.f32.mrf.mxu0 }
 0x1fc   :  { %v776_v32 = vadd.f32 %v762_v29, %v546_v24  ;;  %v821_v33 = vpop.f32.mrf.mxu1 }
 0x1fd   :  { %v840_v34 = vmax.f32 %v778_v25, %v837_v28  ;;  %v835_v35 = vadd.f32 %v821_v33, %v650_v27  ;;  %v1857_v58 = vpop.f32.mrf.mxu0 }
 0x1fe   :  { %v1877_v43 = vpop.f32.mrf.mxu1 }
 0x1ff   :  { %v850_v47 = vadd.f32 %v1563_v31, %v840_v34  ;;  %v838_v45 = vmax.f32 %v776_v32, %v835_v35  ;;  %v765_v46 = vpop.f32.mrf.mxu0  ;;  %v1458_v32 = vlaneseq }
 0x200   :  { %v777_v48 = vadd.f32 %v765_v46, %v549_v60  ;;  %v824_v51 = vpop.f32.mrf.mxu1 }
 0x201   :  { %v853_v52 = vmax.f32 %v850_v47, 0.0  ;;  %v848_v53 = vadd.f32 %v1563_v31, %v838_v45  ;;  %v836_v54 = vadd.f32 %v824_v51, %v653_v44  ;;  %v1459_v35 = vshrl.u32 %v1458_v32, 7  ;;  %v1456_v45 = vld [vmem:[%s2580_s6] sm:$0x3] }
 0x203   :  { %v871_v56 = vmul.f32 %v867_v55, %v853_v52  ;;  %v851_v39 = vmax.f32 %v848_v53, 0.0  ;;  %v839_v22 = vmax.f32 %v777_v48, %v836_v54  ;;  %v1460_v43 = vsub.s32 0, %v1459_v35 }
 0x204   :  { %v1464_v51 = vsub.s32 1, %v1459_v35 }
 0x205   :  { %875 = vst [vmem:[#allocation3 + $0x18] sm:$0xff] %v871_v56  ;;  %v869_v23 = vmul.f32 %v857_v30, %v851_v39  ;;  %v849_v24 = vadd.f32 %v1563_v31, %v839_v22  ;;  %v1461_v39 = vrot.slane %v1456_v45, %v1460_v43 }
 0x207   :  { %873 = vst [vmem:[#allocation3 + $0x8] sm:$0xff] %v869_v23  ;;  %v852_v25 = vmax.f32 %v849_v24, 0.0 }
 0x209   :  { %v870_v50 = vmul.f32 %v862_v49, %v852_v25 }
 0x20b   :  { %874 = vst [vmem:[#allocation3 + $0x10] sm:$0xff] %v870_v50 }
 0x212   :  { %v898_v57 = vld [vmem:[#allocation3 + $0x7] ss:$2 sm:$0xff]  ;;  %v900_v21 = vld [vmem:[#allocation3 + $0x17] ss:$2 sm:$0xf] }
 0x213   :  { %v901_v26 = vpack.c.bf16 %v900_v21, %v898_v57  ;;  %v893_v27 = vld [vmem:[#allocation3 + $0x6] ss:$2 sm:$0xff]  ;;  %v895_v28 = vld [vmem:[#allocation3 + $0x16] ss:$2 sm:$0xf]  ;;  %v1465_v21 = vrot.slane %v1456_v45, %v1464_v51 }
 0x214   :  { %v896_v29 = vpack.c.bf16 %v895_v28, %v893_v27 }
 0x215   :  { %1032 = vmatmul.mubr.bf16.vlgmr.msra.gmra.mxu0 %v901_v26 }
 0x216   :  { %1155 = vmatmul.mubr.bf16.vlgmr.msra.gmra.mxu1 %v896_v29  ;;  %1171 = vmatpush1.bf16.msra.mxu0 %v2289_v36  ;;  %v1967_v36 = vld [vmem:[%s2578_s5 + $0x174] ss:$8 sps:$4 sm:$0xff]  }
 0x217   :  { %1214 = vmatpush1.bf16.msra.mxu1 %v2297_v59  ;;  %1172 = vmatprep.subr.bf16.mxu0 %v2310_v62  ;;  %v1166_v59 = vld [vmem:[#allocation3 + $0x8] ss:$2 sm:$0xff]  ;;  %v1965_v62 = vld [vmem:[%s2578_s5 + $0x170] ss:$8 sps:$4 sm:$0xff]  }
 0x218   :  { %1215 = vmatprep.subr.bf16.mxu1 %v2323_v0  ;;  %1202 = vmatprep.mubr.bf16.mxu0 %v1991_v3  ;;  %v1970_v0 = vld [vmem:[%s2578_s5 + $0x164] ss:$8 sps:$4 sm:$0xff]  }
 0x219   :  { %1245 = vmatprep.mubr.bf16.mxu1 %v1991_v3 }
 0x21a   :  { %1173 = vmatpush1.bf16.msra.mxu0 %v2305_v61  ;;  %v1168_v61 = vld [vmem:[#allocation3 + $0x18] ss:$2 sm:$0xf] }
 0x21b   :  { %1216 = vmatpush1.bf16.msra.mxu1 %v2316_v63  ;;  %1174 = vmatprep.subr.bf16.mxu0 %v2331_v1  ;;  %v1169_v63 = vpack.c.bf16 %v1168_v61, %v1166_v59  ;;  %v1968_v1 = vld [vmem:[%s2578_s5 + $0x160] ss:$8 sps:$4 sm:$0xff]  }
 0x21c   :  { %1217 = vmatprep.subr.bf16.mxu1 %v2336_v2  ;;  %v1973_v2 = vld [vmem:[%s2578_s5 + $0x154] ss:$8 sps:$4 sm:$0xff]  }
 0x21e   :  { %1175 = vmatpush1.bf16.msra.mxu0 %v2341_v4  ;;  %v1971_v4 = vld [vmem:[%s2578_s5 + $0x150] ss:$8 sps:$4 sm:$0xff]  }
 0x21f   :  { %1218 = vmatpush1.bf16.msra.mxu1 %v2346_v5  ;;  %1176 = vmatprep.subr.bf16.mxu0 %v2355_v6  ;;  %v1976_v5 = vld [vmem:[%s2578_s5 + $0x144] ss:$8 sps:$4 sm:$0xff]   ;;  %v1974_v6 = vld [vmem:[%s2578_s5 + $0x140] ss:$8 sps:$4 sm:$0xff]  }
 0x220   :  { %1219 = vmatprep.subr.bf16.mxu1 %v2360_v7  ;;  %v1977_v7 = vld [vmem:[%s2578_s5 + $0x130] ss:$8 sps:$4 sm:$0xff]  }
 0x222   :  { %1177 = vmatpush1.bf16.msra.mxu0 %v2365_v8  ;;  %v1982_v8 = vld [vmem:[%s2578_s5 + $0x124] ss:$8 sps:$4 sm:$0xff]  }
 0x223   :  { %1220 = vmatpush1.bf16.msra.mxu1 %v2370_v9  ;;  %1178 = vmatprep.subr.bf16.mxu0 %v2379_v10  ;;  %v1980_v9 = vld [vmem:[%s2578_s5 + $0x120] ss:$8 sps:$4 sm:$0xff]   ;;  %v1985_v10 = vld [vmem:[%s2578_s5 + $0x114] ss:$8 sps:$4 sm:$0xff]  }
 0x224   :  { %1221 = vmatprep.subr.bf16.mxu1 %v2384_v11  ;;  %v1983_v11 = vld [vmem:[%s2578_s5 + $0x110] ss:$8 sps:$4 sm:$0xff]  }
 0x226   :  { %1179 = vmatpush1.bf16.msra.mxu0 %v2389_v12  ;;  %v1988_v12 = vld [vmem:[%s2578_s5 + $0x104] ss:$8 sps:$4 sm:$0xff]  }
 0x227   :  { %1222 = vmatpush1.bf16.msra.mxu1 %v2394_v13  ;;  %1180 = vmatprep.subr.bf16.mxu0 %v2403_v14  ;;  %v1986_v13 = vld [vmem:[%s2578_s5 + $0x100] ss:$8 sps:$4 sm:$0xff]  }
 0x228   :  { %1223 = vmatprep.subr.bf16.mxu1 %v2408_v15  ;;  %v1401_v14 = vld [vmem:[#allocation3 + $0x9] ss:$2 sm:$0xff]  ;;  %v1403_v15 = vld [vmem:[#allocation3 + $0x19] ss:$2 sm:$0xf] }
 0x22a   :  { %1181 = vmatpush1.bf16.msra.mxu0 %v2413_v16  ;;  %v1404_v16 = vpack.c.bf16 %v1403_v15, %v1401_v14 }
 0x22b   :  { %1224 = vmatpush1.bf16.msra.mxu1 %v2418_v17  ;;  %1182 = vmatprep.subr.bf16.mxu0 %v2427_v18 }
 0x22c   :  { %1225 = vmatprep.subr.bf16.mxu1 %v2432_v19 }
 0x22e   :  { %1183 = vmatpush1.bf16.msra.mxu0 %v2437_v20 }
 0x22f   :  { %1226 = vmatpush1.bf16.msra.mxu1 %v2442_v37  ;;  %1184 = vmatprep.subr.bf16.mxu0 %v2449_v38 }
 0x230   :  { %1227 = vmatprep.subr.bf16.mxu1 %v2454_v40 }
 0x232   :  { %1185 = vmatpush1.bf16.msra.mxu0 %v2461_v41 }
 0x233   :  { %1228 = vmatpush1.bf16.msra.mxu1 %v2466_v42  ;;  %1353 = vmatprep.subr.bf16.mxu0 %v1967_v36 }
 0x234   :  { %1405 = vmatprep.subr.bf16.mxu1 %v1967_v36 }
 0x235   :  { %1203 = vmatmul.mubr.bf16.vlgmr.msra.gmra.mxu0 %v1169_v63 }
 0x236   :  { %1246 = vmatmul.mubr.bf16.vlgmr.msra.gmra.mxu1 %v901_v26  ;;  %1354 = vmatpush1.bf16.msra.mxu0 %v1965_v62 }
 0x237   :  { %1406 = vmatpush1.bf16.msra.mxu1 %v1965_v62  ;;  %1355 = vmatprep.subr.bf16.mxu0 %v1970_v0 }
 0x238   :  { %1407 = vmatprep.subr.bf16.mxu1 %v1970_v0  ;;  %1385 = vmatprep.mubr.bf16.mxu0 %v1991_v3 }
 0x239   :  { %1437 = vmatprep.mubr.bf16.mxu1 %v1991_v3  ;;  %v1979_v3 = vld [vmem:[%s2578_s5 + $0x134] ss:$8 sps:$4 sm:$0xff]  }
 0x23a   :  { %1356 = vmatpush1.bf16.msra.mxu0 %v1968_v1 }
 0x23b   :  { %1408 = vmatpush1.bf16.msra.mxu1 %v1968_v1  ;;  %1357 = vmatprep.subr.bf16.mxu0 %v1973_v2 }
 0x23c   :  { %1409 = vmatprep.subr.bf16.mxu1 %v1973_v2 }
 0x23e   :  { %1358 = vmatpush1.bf16.msra.mxu0 %v1971_v4 }
 0x23f   :  { %1410 = vmatpush1.bf16.msra.mxu1 %v1971_v4  ;;  %1359 = vmatprep.subr.bf16.mxu0 %v1976_v5 }
 0x240   :  { %1411 = vmatprep.subr.bf16.mxu1 %v1976_v5 }
 0x242   :  { %1360 = vmatpush1.bf16.msra.mxu0 %v1974_v6 }
 0x243   :  { %1412 = vmatpush1.bf16.msra.mxu1 %v1974_v6  ;;  %1361 = vmatprep.subr.bf16.mxu0 %v1979_v3 }
 0x244   :  { %1413 = vmatprep.subr.bf16.mxu1 %v1979_v3 }
 0x246   :  { %1362 = vmatpush1.bf16.msra.mxu0 %v1977_v7 }
 0x247   :  { %1414 = vmatpush1.bf16.msra.mxu1 %v1977_v7  ;;  %1363 = vmatprep.subr.bf16.mxu0 %v1982_v8 }
 0x248   :  { %1415 = vmatprep.subr.bf16.mxu1 %v1982_v8 }
 0x24a   :  { %1364 = vmatpush1.bf16.msra.mxu0 %v1980_v9 }
 0x24b   :  { %1416 = vmatpush1.bf16.msra.mxu1 %v1980_v9  ;;  %1365 = vmatprep.subr.bf16.mxu0 %v1985_v10 }
 0x24c   :  { %1417 = vmatprep.subr.bf16.mxu1 %v1985_v10 }
 0x24e   :  { %1366 = vmatpush1.bf16.msra.mxu0 %v1983_v11 }
 0x24f   :  { %1418 = vmatpush1.bf16.msra.mxu1 %v1983_v11  ;;  %1367 = vmatprep.subr.bf16.mxu0 %v1988_v12 }
 0x250   :  { %1419 = vmatprep.subr.bf16.mxu1 %v1988_v12 }
 0x252   :  { %1368 = vmatpush1.bf16.msra.mxu0 %v1986_v13 }
 0x253   :  { %1420 = vmatpush1.bf16.msra.mxu1 %v1986_v13 }
 0x255   :  { %1386 = vmatmul.mubr.bf16.vlgmr.msra.gmra.mxu0 %v1169_v63 }
 0x256   :  { %1438 = vmatmul.mubr.bf16.vlgmr.msra.gmra.mxu1 %v1404_v16 }
 0x2d5   :  { %v1033_v17 = vpop.f32.mrf.mxu0 }
 0x2d6   :  { %v1156_v18 = vpop.f32.mrf.mxu1 }
 0x2d7   :  { %v1035_v19 = vpop.f32.mrf.mxu0  ;;  %v1157_v44 = vadd.f32 %v1156_v18, %v1033_v17 }
 0x2d8   :  { %v1158_v20 = vpop.f32.mrf.mxu1 }
 0x2d9   :  { %v1037_v37 = vpop.f32.mrf.mxu0  ;;  %v1159_v52 = vadd.f32 %v1158_v20, %v1035_v19 }
 0x2da   :  { %v1160_v38 = vpop.f32.mrf.mxu1 }
 0x2db   :  { %v1039_v40 = vpop.f32.mrf.mxu0  ;;  %v1161_v23 = vadd.f32 %v1160_v38, %v1037_v37 }
 0x2dc   :  { %v1162_v41 = vpop.f32.mrf.mxu1 }
 0x2dd   :  { %v1163_v27 = vadd.f32 %v1162_v41, %v1039_v40 }
 0x2f5   :  { %v1204_v42 = vpop.f32.mrf.mxu0 }
 0x2f6   :  { %v1247_v30 = vpop.f32.mrf.mxu1 }
 0x2f7   :  { %v1206_v31 = vpop.f32.mrf.mxu0  ;;  %v1248_v46 = vadd.f32 %v1247_v30, %v1204_v42 }
 0x2f8   :  { %v1249_v33 = vpop.f32.mrf.mxu1 }
 0x2f9   :  { %v1208_v34 = vpop.f32.mrf.mxu0  ;;  %v1250_v55 = vadd.f32 %v1249_v33, %v1206_v31 }
 0x2fa   :  { %v1251_v58 = vpop.f32.mrf.mxu1 }
 0x2fb   :  { %v1210_v60 = vpop.f32.mrf.mxu0  ;;  %v1252_v49 = vadd.f32 %v1251_v58, %v1208_v34 }
 0x2fc   :  { %v1253_v47 = vpop.f32.mrf.mxu1 }
 0x2fd   :  { %v1254_v36 = vadd.f32 %v1253_v47, %v1210_v60 }
 0x315   :  { %v1387_v48 = vpop.f32.mrf.mxu0 }
 0x316   :  { %v1396_v53 = vadd.f32 %v1387_v48, %v1157_v44  ;;  %v1439_v54 = vpop.f32.mrf.mxu1 }
 0x317   :  { %v1448_v56 = vadd.f32 %v1439_v54, %v1248_v46  ;;  %v1389_v22 = vpop.f32.mrf.mxu0 }
 0x318   :  { %v1397_v24 = vadd.f32 %v1389_v22, %v1159_v52  ;;  %v1441_v25 = vpop.f32.mrf.mxu1 }
 0x319   :  { %v1452_v50 = vmax.f32 %v1396_v53, %v1448_v56  ;;  %v1449_v57 = vadd.f32 %v1441_v25, %v1250_v55  ;;  %v1391_v26 = vpop.f32.mrf.mxu0 }
 0x31a   :  { %v1398_v28 = vadd.f32 %v1391_v26, %v1161_v23  ;;  %v1443_v29 = vpop.f32.mrf.mxu1 }
 0x31b   :  { %v1468_v59 = vadd.f32 %v1461_v39, %v1452_v50  ;;  %v1453_v61 = vmax.f32 %v1397_v24, %v1449_v57  ;;  %v1450_v62 = vadd.f32 %v1443_v29, %v1252_v49  ;;  %v1393_v63 = vpop.f32.mrf.mxu0 }
 0x31c   :  { %v1399_v0 = vadd.f32 %v1393_v63, %v1163_v27  ;;  %v1445_v1 = vpop.f32.mrf.mxu1 }
 0x31d   :  { %v1472_v2 = vmax.f32 %v1468_v59, 0.0  ;;  %v1469_v4 = vadd.f32 %v1465_v21, %v1453_v61  ;;  %v1454_v5 = vmax.f32 %v1398_v28, %v1450_v62  ;;  %v1451_v6 = vadd.f32 %v1445_v1, %v1254_v36 }
 0x31f   :  { %1476 = vst [vmem:[%s2581_s9] sm:$0xff] %v1472_v2  ;;  %v1473_v3 = vmax.f32 %v1469_v4, 0.0  ;;  %v1470_v7 = vadd.f32 %v1461_v39, %v1454_v5  ;;  %v1455_v8 = vmax.f32 %v1399_v0, %v1451_v6 }
 0x321   :  { %1477 = vst [vmem:[%s2581_s9 + $0x8] sm:$0xff] %v1473_v3  ;;  %v1474_v9 = vmax.f32 %v1470_v7, 0.0  ;;  %v1471_v10 = vadd.f32 %v1465_v21, %v1455_v8 }
 0x323   :  { %1478 = vst [vmem:[%s2581_s9 + $0x10] sm:$0xf] %v1474_v9  ;;  %v1475_v11 = vmax.f32 %v1471_v10, 0.0 }
 0x325   :  { %1479 = vst [vmem:[%s2581_s9 + $0x18] sm:$0xf] %v1475_v11 }

</bundles_post_ra>
